<compile_context>
chip_gen: v7x
topology: tpu7x:2x2x1
jax: 0.10.0
libtpu: 0.0.40
codegen_flags: <defaults>
</compile_context>

<pallas_src>
import jax
import jax.numpy as jnp
from jax.experimental import pallas as pl
from jax.experimental.pallas import tpu as pltpu


_LANE = 128
_SUBLANE = 8
_MIB = 1024 * 1024

# Narrow fallback set: lowering rejections / config errors only — real Python
# bugs (TypeError/AttributeError/etc.) still surface.
_FALLBACK_ERRORS = (pltpu.LoweringException, NotImplementedError, ValueError)
if hasattr(jax, "errors") and hasattr(jax.errors, "JaxRuntimeError"):
    _FALLBACK_ERRORS = _FALLBACK_ERRORS + (jax.errors.JaxRuntimeError,)


def _round_up(x, m):
    return (x + m - 1) // m * m


def _pad2d(a, rows, cols):
    return jnp.pad(a, ((0, rows - a.shape[0]), (0, cols - a.shape[1])))


def _vmem_caps():
    """Generation-aware (budget, limit) bytes; conservative v7x-safe fallback."""
    cap = 64 * _MIB                      # v7x per-TensorCore VMEM (safe default)
    try:
        cap = int(pltpu.get_tpu_info().vmem_capacity_bytes)
    except Exception:                    # capability probe only; keep safe default
        pass
    budget = max(24 * _MIB, cap - 24 * _MIB)   # v7x: 40 MiB, v5e/v6e: 104 MiB
    limit = max(32 * _MIB, cap - 16 * _MIB)    # v7x: 48 MiB, v5e/v6e: 112 MiB
    return budget, limit


def _fused_vmem_bytes(bt, lp, hp, op, out_size):
    zb = 2 * bt * lp * 2                        # double-buffered bf16 z tile
    ob = 2 * bt * op * out_size                 # double-buffered output tile
    wb = (lp * hp + hp * hp + hp * op) * 2      # resident bf16 weights
    bb = (2 * hp + op) * 4                      # resident f32 biases
    tmp = bt * hp * (4 + 4 + 2)                 # h1/h2 f32 temps + bf16 cast
    return zb + ob + wb + bb + tmp


def _tiled_vmem_bytes(bt, tn, lp, hp, op, out_size):
    zb = 2 * bt * lp * 2
    ob = 2 * bt * op * out_size
    wres = lp * hp * 2 + (hp + op) * 4               # resident w1(bf16) + b1/b3(f32)
    wstr = 2 * (hp * tn * 2 + tn * op * 2 + tn * 4)  # streamed w2/w3/b2, double-buffered
    scr = bt * hp * 2 + bt * op * 4                  # h1 scratch (bf16) + fc3 acc (f32)
    tmp = bt * tn * (4 + 2)                          # h2 chunk f32 + bf16 cast
    return zb + ob + wres + wstr + scr + tmp


def _decoder_fused_kernel(z_ref, w1_ref, b1_ref, w2_ref, b2_ref, w3_ref, b3_ref,
                          o_ref):
    # fc1: bf16 MXU matmul, f32 accumulation; bias + ReLU in f32 (Dropout = identity).
    h1 = jnp.dot(z_ref[...], w1_ref[...], preferred_element_type=jnp.float32)
    h1 = jnp.maximum(h1 + b1_ref[...], 0.0)
    # fc2.
    h2 = jnp.dot(h1.astype(jnp.bfloat16), w2_ref[...],
                 preferred_element_type=jnp.float32)
    h2 = jnp.maximum(h2 + b2_ref[...], 0.0)
    # fc3 + sigmoid.
    logits = jnp.dot(h2.astype(jnp.bfloat16), w3_ref[...],
                     preferred_element_type=jnp.float32)
    o_ref[...] = jax.nn.sigmoid(logits + b3_ref[...]).astype(o_ref.dtype)


def _decoder_tiled_kernel(z_ref, w1_ref, b1_ref, w2_ref, b2_ref, w3_ref, b3_ref,
                          o_ref, h1_ref, acc_ref):
    # Grid = (batch tiles, hidden-column tiles of fc2 / row tiles of fc3).
    n = pl.program_id(1)

    @pl.when(n == 0)
    def _():
        # fc1 once per batch tile; keep h1 resident as bf16; zero the fc3 accumulator.
        h1 = jnp.dot(z_ref[...], w1_ref[...], preferred_element_type=jnp.float32)
        h1_ref[...] = jnp.maximum(h1 + b1_ref[...], 0.0).astype(jnp.bfloat16)
        acc_ref[...] = jnp.zeros_like(acc_ref)

    # fc2 for hidden columns [n*tn, (n+1)*tn): full contraction over resident h1.
    h2c = jnp.dot(h1_ref[...], w2_ref[...], preferred_element_type=jnp.float32)
    h2c = jnp.maximum(h2c + b2_ref[...], 0.0)
    # fc3 partial sum for this hidden chunk.
    acc_ref[...] += jnp.dot(h2c.astype(jnp.bfloat16), w3_ref[...],
                            preferred_element_type=jnp.float32)

    @pl.when(n == pl.num_programs(1) - 1)
    def _():
        o_ref[...] = jax.nn.sigmoid(acc_ref[...] + b3_ref[...]).astype(o_ref.dtype)


def decoder_forward(z, params, *, batch_tile=512, out_dtype=jnp.float32,
                    path="auto", tile_n=None):
    """z: [B, latent_dim]. params: dict of [in, out] weights (PyTorch W.T).

    path: "auto" | "fused" (all weights resident) | "tiled" (stream w2/w3 over a
    hidden-dim grid axis). out_dtype=jnp.bfloat16 halves output HBM writeback.
    tile_n: optional hidden-tile override (multiple of 128) for the tiled path.
    """
    assert path in ("auto", "fused", "tiled")
    B, latent_dim = z.shape
    hidden_dim = params["w1"].shape[1]
    output_dim = params["w3"].shape[1]
    out_size = jnp.dtype(out_dtype).itemsize

    # Lane-pad feature dims (dense MXU tiles, unmasked lane-dense stores).
    lp = _round_up(latent_dim, _LANE)
    hp = _round_up(hidden_dim, _LANE)
    op = _round_up(output_dim, _LANE)

    budget, limit = _vmem_caps()

    # Batch tile: multiple of 8, capped by request and by B; capped at ceil(B/2)
    # so the "parallel" batch axis has >=2 steps to feed both v7x TensorCores.
    bt = min(_round_up(batch_tile, _SUBLANE), _round_up(B, _SUBLANE))
    if _round_up(B, _SUBLANE) >= 2 * _SUBLANE:
        bt = min(bt, _round_up(pl.cdiv(B, 2), _SUBLANE))
    bt_floor = min(bt, 16 * _SUBLANE)   # never shrink below 128 rows for VMEM

    use_tiled = path == "tiled"
    if not use_tiled:
        bt_f = bt
        while bt_f > bt_floor and _fused_vmem_bytes(bt_f, lp, hp, op, out_size) > budget:
            bt_f = max(bt_floor, _round_up(bt_f // 2, _SUBLANE))
        if path == "fused" or _fused_vmem_bytes(bt_f, lp, hp, op, out_size) <= budget:
            bt = bt_f
        else:
            use_tiled = True   # resident weights alone blow VMEM -> stream w2/w3

    tn = None
    if use_tiled:
        cands = (tile_n,) if tile_n is not None else (512, 256, 128)
        for cand in cands:
            c = cand if tile_n is not None else min(cand, hp)
            hp_c = _round_up(hidden_dim, c)
            if _tiled_vmem_bytes(bt, c, lp, hp_c, op, out_size) <= budget:
                tn, hp = c, hp_c
                break
        if tn is None:   # still too big: smallest hidden tile, shrink bt to the floor
            tn = cands[-1] if tile_n is not None else min(128, hp)
            hp = _round_up(hidden_dim, tn)
            while bt > bt_floor and _tiled_vmem_bytes(bt, tn, lp, hp, op, out_size) > budget:
                bt = max(bt_floor, _round_up(bt // 2, _SUBLANE))
        assert tn % _LANE == 0 and hp % tn == 0

    bp = _round_up(B, bt)
    grid_b = bp // bt

    # Zero-padded operands. Zero rows/cols + zero bias pass through Linear/ReLU
    # unchanged, so slicing the padded result is exact.
    z_p = _pad2d(z.astype(jnp.bfloat16), bp, lp)          # bf16 stream: half the bytes
    w1 = _pad2d(params["w1"], lp, hp).astype(jnp.bfloat16)
    w2 = _pad2d(params["w2"], hp, hp).astype(jnp.bfloat16)
    w3 = _pad2d(params["w3"], hp, op).astype(jnp.bfloat16)
    b1 = _pad2d(params["b1"], 1, hp).astype(jnp.float32)
    b2 = _pad2d(params["b2"], 1, hp).astype(jnp.float32)
    b3 = _pad2d(params["b3"], 1, op).astype(jnp.float32)

    cost = pl.CostEstimate(
        flops=2 * bp * (lp * hp + hp * hp + hp * op),
        transcendentals=bp * op,                            # sigmoid
        bytes_accessed=(z_p.size * 2
                        + (w1.size + w2.size + w3.size) * 2
                        + (b1.size + b2.size + b3.size) * 4
                        + bp * op * out_size),
    )

    def _spec(shape, idx, mode=None):
        if mode is None:
            return pl.BlockSpec(shape, idx)
        return pl.BlockSpec(shape, idx, pipeline_mode=mode)

    def _cparams(sem):
        return pltpu.CompilerParams(dimension_semantics=sem, vmem_limit_bytes=limit)

    def _call_fused(buffered):
        wmode = pl.Buffered(1) if buffered else None
        # Small-hidden regime is DMA-latency bound: deepen the z input pipeline.
        zmode = (pl.Buffered(3)
                 if buffered and hp <= 2 * _LANE and grid_b >= 3 else None)
        return pl.pallas_call(
            _decoder_fused_kernel,
            out_shape=jax.ShapeDtypeStruct((bp, op), out_dtype),
            grid_spec=pltpu.PrefetchScalarGridSpec(
                num_scalar_prefetch=0,
                grid=(grid_b,),
                in_specs=[
                    _spec((bt, lp), lambda i: (i, 0), zmode),   # z tile (pipelined)
                    _spec((lp, hp), lambda i: (0, 0), wmode),   # w1 (resident)
                    _spec((1, hp), lambda i: (0, 0), wmode),    # b1
                    _spec((hp, hp), lambda i: (0, 0), wmode),   # w2
                    _spec((1, hp), lambda i: (0, 0), wmode),    # b2
                    _spec((hp, op), lambda i: (0, 0), wmode),   # w3
                    _spec((1, op), lambda i: (0, 0), wmode),    # b3
                ],
                out_specs=pl.BlockSpec((bt, op), lambda i: (i, 0)),
            ),
            compiler_params=_cparams(("parallel",)),
            cost_estimate=cost,
        )(z_p, w1, b1, w2, b2, w3, b3)

    def _call_tiled(buffered):
        wmode = pl.Buffered(1) if buffered else None
        grid_n = hp // tn
        return pl.pallas_call(
            _decoder_tiled_kernel,
            out_shape=jax.ShapeDtypeStruct((bp, op), out_dtype),
            grid_spec=pltpu.PrefetchScalarGridSpec(
                num_scalar_prefetch=0,
                grid=(grid_b, grid_n),
                in_specs=[
                    _spec((bt, lp), lambda i, n: (i, 0)),        # z tile
                    _spec((lp, hp), lambda i, n: (0, 0), wmode), # w1 (resident)
                    _spec((1, hp), lambda i, n: (0, 0), wmode),  # b1 (resident)
                    _spec((hp, tn), lambda i, n: (0, n)),        # w2 column block
                    _spec((1, tn), lambda i, n: (0, n)),         # b2 chunk
                    _spec((tn, op), lambda i, n: (n, 0)),        # w3 row block
                    _spec((1, op), lambda i, n: (0, 0), wmode),  # b3 (resident)
                ],
                out_specs=pl.BlockSpec((bt, op), lambda i, n: (i, 0)),
                scratch_shapes=[
                    pltpu.VMEM((bt, hp), jnp.bfloat16),   # h1 resident per batch tile
                    pltpu.VMEM((bt, op), jnp.float32),    # fc3 accumulator
                ],
            ),
            compiler_params=_cparams(("parallel", "arbitrary")),
            cost_estimate=cost,
        )(z_p, w1, b1, w2, b2, w3, b3)

    call = _call_tiled if use_tiled else _call_fused
    try:
        out_p = call(True)
    except _FALLBACK_ERRORS:
        out_p = call(False)    # built lazily; default double-buffering everywhere

    return out_p[:B, :output_dim]


def init_params(key, latent_dim, hidden_dim, output_dim):
    """Deterministic init; weights stored as [in, out] (i.e. PyTorch W.T)."""
    k1, k2, k3, k4, k5, k6 = jax.random.split(key, 6)
    s1 = 1.0 / jnp.sqrt(latent_dim)
    s2 = 1.0 / jnp.sqrt(hidden_dim)
    return {
        "w1": jax.random.uniform(k1, (latent_dim, hidden_dim), jnp.float32, -s1, s1),
        "b1": jax.random.uniform(k2, (1, hidden_dim), jnp.float32, -s1, s1),
        "w2": jax.random.uniform(k3, (hidden_dim, hidden_dim), jnp.float32, -s2, s2),
        "b2": jax.random.uniform(k4, (1, hidden_dim), jnp.float32, -s2, s2),
        "w3": jax.random.uniform(k5, (hidden_dim, output_dim), jnp.float32, -s2, s2),
        "b3": jax.random.uniform(k6, (1, output_dim), jnp.float32, -s2, s2),
    }


def decoder_reference(z, params):
    """Pure-JAX f32 reference for correctness checking."""
    h = jax.nn.relu(z @ params["w1"] + params["b1"])
    h = jax.nn.relu(h @ params["w2"] + params["b2"])
    return jax.nn.sigmoid(h @ params["w3"] + params["b3"])


if __name__ == "__main__":
    key = jax.random.PRNGKey(0)
    k1, k2, k3, k4 = jax.random.split(key, 4)

    # 1) Default (auto -> fused, resident-weight) path at the module's small dims.
    latent_dim, hidden_dim, output_dim, batch = 16, 32, 64, 8
    z = jax.random.normal(k1, (batch, latent_dim), jnp.float32)
    params = init_params(k2, latent_dim, hidden_dim, output_dim)
    out = jax.block_until_ready(decoder_forward(z, params))
    ref = decoder_reference(z, params)
    assert out.shape == (batch, output_dim)
    # bf16 matmul operands with f32 accumulation -> slightly relaxed tolerance.
    assert jnp.allclose(out, ref, atol=2e-2, rtol=2e-2), "fused path mismatch"

    # 2) Exercise the weight-streaming (hidden-tiled) path with 2 reduction steps.
    lat2, hid2, outd2, bat2 = 16, 192, 64, 8
    z2 = jax.random.normal(k3, (bat2, lat2), jnp.float32)
    params2 = init_params(k4, lat2, hid2, outd2)
    out2 = jax.block_until_ready(
        decoder_forward(z2, params2, path="tiled", tile_n=128))
    ref2 = decoder_reference(z2, params2)
    assert out2.shape == (bat2, outd2)
    assert jnp.allclose(out2, ref2, atol=2e-2, rtol=2e-2), "tiled path mismatch"

    print("KERNEL_OK")
</pallas_src>

<mosaic_0001>
module attributes {stable_mosaic.version = 11 : i64} {
  func.func @_decoder_fused_kernel(%arg0: i32, %arg1: memref<8x128xbf16, #tpu.memory_space<vmem>>, %arg2: memref<128x128xbf16, #tpu.memory_space<vmem>>, %arg3: memref<1x128xf32, #tpu.memory_space<vmem>>, %arg4: memref<128x128xbf16, #tpu.memory_space<vmem>>, %arg5: memref<1x128xf32, #tpu.memory_space<vmem>>, %arg6: memref<128x128xbf16, #tpu.memory_space<vmem>>, %arg7: memref<1x128xf32, #tpu.memory_space<vmem>>, %arg8: memref<8x128xf32, #tpu.memory_space<vmem>>) attributes {dimension_semantics = [#tpu.dimension_semantics<parallel>], iteration_bounds = array<i64: 1>, scalar_prefetch = 0 : i64, scratch_operands = 0 : i64, tpu.core_type = #tpu.core_type<tc>, window_params = [{transform_indices = @transform_0, window_bounds = array<i64: 8, 128>}, {pipeline_mode = #tpu.pipeline_mode<synchronous>, transform_indices = @transform_1, window_bounds = array<i64: 128, 128>}, {pipeline_mode = #tpu.pipeline_mode<synchronous>, transform_indices = @transform_2, window_bounds = array<i64: 1, 128>}, {pipeline_mode = #tpu.pipeline_mode<synchronous>, transform_indices = @transform_3, window_bounds = array<i64: 128, 128>}, {pipeline_mode = #tpu.pipeline_mode<synchronous>, transform_indices = @transform_4, window_bounds = array<i64: 1, 128>}, {pipeline_mode = #tpu.pipeline_mode<synchronous>, transform_indices = @transform_5, window_bounds = array<i64: 128, 128>}, {pipeline_mode = #tpu.pipeline_mode<synchronous>, transform_indices = @transform_6, window_bounds = array<i64: 1, 128>}, {transform_indices = @transform_7, window_bounds = array<i64: 8, 128>}]} {
    %c0 = arith.constant 0 : index
    %c0_0 = arith.constant 0 : index
    %0 = vector.load %arg1[%c0, %c0_0] : memref<8x128xbf16, #tpu.memory_space<vmem>>, vector<8x128xbf16>
    %c0_1 = arith.constant 0 : index
    %c0_2 = arith.constant 0 : index
    %1 = vector.load %arg2[%c0_1, %c0_2] : memref<128x128xbf16, #tpu.memory_space<vmem>>, vector<128x128xbf16>
    %cst = arith.constant dense<0.000000e+00> : vector<8x128xf32>
    %2 = tpu.matmul %0, %1, %cst {dimension_numbers = #tpu.dot_dimension_numbers<[1], [0], [0], [1], [0, 0, 1, 1], [], []>} : vector<8x128xbf16>, vector<128x128xbf16>, vector<8x128xf32> -> vector<8x128xf32>
    %c0_3 = arith.constant 0 : index
    %c0_4 = arith.constant 0 : index
    %3 = vector.load %arg3[%c0_3, %c0_4] : memref<1x128xf32, #tpu.memory_space<vmem>>, vector<1x128xf32>
    %4 = vector.broadcast %3 : vector<1x128xf32> to vector<8x128xf32>
    %5 = arith.addf %2, %4 : vector<8x128xf32>
    %cst_5 = arith.constant 0.000000e+00 : f32
    %6 = vector.broadcast %cst_5 : f32 to vector<8x128xf32>
    %7 = arith.maximumf %5, %6 : vector<8x128xf32>
    %8 = arith.truncf %7 : vector<8x128xf32> to vector<8x128xbf16>
    %c0_6 = arith.constant 0 : index
    %c0_7 = arith.constant 0 : index
    %9 = vector.load %arg4[%c0_6, %c0_7] : memref<128x128xbf16, #tpu.memory_space<vmem>>, vector<128x128xbf16>
    %cst_8 = arith.constant dense<0.000000e+00> : vector<8x128xf32>
    %10 = tpu.matmul %8, %9, %cst_8 {dimension_numbers = #tpu.dot_dimension_numbers<[1], [0], [0], [1], [0, 0, 1, 1], [], []>} : vector<8x128xbf16>, vector<128x128xbf16>, vector<8x128xf32> -> vector<8x128xf32>
    %c0_9 = arith.constant 0 : index
    %c0_10 = arith.constant 0 : index
    %11 = vector.load %arg5[%c0_9, %c0_10] : memref<1x128xf32, #tpu.memory_space<vmem>>, vector<1x128xf32>
    %12 = vector.broadcast %11 : vector<1x128xf32> to vector<8x128xf32>
    %13 = arith.addf %10, %12 : vector<8x128xf32>
    %cst_11 = arith.constant 0.000000e+00 : f32
    %14 = vector.broadcast %cst_11 : f32 to vector<8x128xf32>
    %15 = arith.maximumf %13, %14 : vector<8x128xf32>
    %16 = arith.truncf %15 : vector<8x128xf32> to vector<8x128xbf16>
    %c0_12 = arith.constant 0 : index
    %c0_13 = arith.constant 0 : index
    %17 = vector.load %arg6[%c0_12, %c0_13] : memref<128x128xbf16, #tpu.memory_space<vmem>>, vector<128x128xbf16>
    %cst_14 = arith.constant dense<0.000000e+00> : vector<8x128xf32>
    %18 = tpu.matmul %16, %17, %cst_14 {dimension_numbers = #tpu.dot_dimension_numbers<[1], [0], [0], [1], [0, 0, 1, 1], [], []>} : vector<8x128xbf16>, vector<128x128xbf16>, vector<8x128xf32> -> vector<8x128xf32>
    %c0_15 = arith.constant 0 : index
    %c0_16 = arith.constant 0 : index
    %19 = vector.load %arg7[%c0_15, %c0_16] : memref<1x128xf32, #tpu.memory_space<vmem>>, vector<1x128xf32>
    %20 = vector.broadcast %19 : vector<1x128xf32> to vector<8x128xf32>
    %21 = arith.addf %18, %20 : vector<8x128xf32>
    %22 = arith.negf %21 : vector<8x128xf32>
    %23 = math.exp %22 : vector<8x128xf32>
    %cst_17 = arith.constant 1.000000e+00 : f32
    %24 = vector.broadcast %cst_17 : f32 to vector<8x128xf32>
    %25 = arith.addf %24, %23 : vector<8x128xf32>
    %26 = arith.divf %24, %25 : vector<8x128xf32>
    %c0_18 = arith.constant 0 : index
    %c0_19 = arith.constant 0 : index
    %27 = vector.load %arg8[%c0_18, %c0_19] : memref<8x128xf32, #tpu.memory_space<vmem>>, vector<8x128xf32>
    tpu.vector_store %arg8[%c0_18, %c0_19], %26 {strides = array<i32>} : memref<8x128xf32, #tpu.memory_space<vmem>>, vector<8x128xf32>,
    return
  }
  func.func @transform_0(%arg0: i32) -> (i32, i32) {
    %c0_i32 = arith.constant 0 : i32
    %c0_i32_0 = arith.constant 0 : i32
    return %arg0, %c0_i32 : i32, i32
  }
  func.func @transform_1(%arg0: i32) -> (i32, i32) {
    %c0_i32 = arith.constant 0 : i32
    %c0_i32_0 = arith.constant 0 : i32
    %c0_i32_1 = arith.constant 0 : i32
    return %c0_i32, %c0_i32_0 : i32, i32
  }
  func.func @transform_2(%arg0: i32) -> (i32, i32) {
    %c0_i32 = arith.constant 0 : i32
    %c0_i32_0 = arith.constant 0 : i32
    %c0_i32_1 = arith.constant 0 : i32
    return %c0_i32, %c0_i32_0 : i32, i32
  }
  func.func @transform_3(%arg0: i32) -> (i32, i32) {
    %c0_i32 = arith.constant 0 : i32
    %c0_i32_0 = arith.constant 0 : i32
    %c0_i32_1 = arith.constant 0 : i32
    return %c0_i32, %c0_i32_0 : i32, i32
  }
  func.func @transform_4(%arg0: i32) -> (i32, i32) {
    %c0_i32 = arith.constant 0 : i32
    %c0_i32_0 = arith.constant 0 : i32
    %c0_i32_1 = arith.constant 0 : i32
    return %c0_i32, %c0_i32_0 : i32, i32
  }
  func.func @transform_5(%arg0: i32) -> (i32, i32) {
    %c0_i32 = arith.constant 0 : i32
    %c0_i32_0 = arith.constant 0 : i32
    %c0_i32_1 = arith.constant 0 : i32
    return %c0_i32, %c0_i32_0 : i32, i32
  }
  func.func @transform_6(%arg0: i32) -> (i32, i32) {
    %c0_i32 = arith.constant 0 : i32
    %c0_i32_0 = arith.constant 0 : i32
    %c0_i32_1 = arith.constant 0 : i32
    return %c0_i32, %c0_i32_0 : i32, i32
  }
  func.func @transform_7(%arg0: i32) -> (i32, i32) {
    %c0_i32 = arith.constant 0 : i32
    %c0_i32_0 = arith.constant 0 : i32
    return %arg0, %c0_i32 : i32, i32
  }
}

</mosaic_0001>

<bundles_post_ra>
// kernel: tpu_custom_call.1
= control target key start
LH: loop header
LB: loop body
LE: loop exit
PB: predicated region body
PF: predicated region fallthrough
CT: control target
= control target key end

     0   :  { %12 = vsyncpa [#allocation3], 0  ;;  %s870_s0 = inlined_call_operand.hbm [shape: bf16[8,128], index: 0, kind: input, shape index: {}]   ;;  %s871_s1 = inlined_call_operand.hbm [shape: bf16[128,128], index: 1, kind: input, shape index: {}]   ;;  %s872_s2 = inlined_call_operand.vmem [shape: f32[1,128], index: 2, kind: input, shape index: {}]   ;;  %s873_s3 = inlined_call_operand.hbm [shape: bf16[128,128], index: 3, kind: input, shape index: {}]   ;;  %s874_s4 = inlined_call_operand.vmem [shape: f32[1,128], index: 4, kind: input, shape index: {}]   ;;  %s875_s5 = inlined_call_operand.hbm [shape: bf16[128,128], index: 5, kind: input, shape index: {}]   ;;  %s876_s6 = inlined_call_operand.vmem [shape: f32[1,128], index: 6, kind: input, shape index: {}]   ;;  %s877_s7 = inlined_call_operand.hbm [shape: f32[8,128], index: 7, kind: output, shape index: {}]  }
   0x1   :  { %13 = vsyncpa [#allocation6], 0 }
   0x2   :  { %14 = vsyncpa [#allocation9], 0 }
   0x3   :  { %15 = vsyncpa [#allocation4], 0  ;;  %s713_s24 = smov [#allocation5]   ;;  %s595_s28 = scalar_lea.hbm %s871_s1, 1024 }
   0x4   :  { %s31_s25 = sshll.u32 %s713_s24, 4  ;;  %p596_p0 = scmp.ne.s32.totalorder %s871_s1, %s595_s28  ;;  %s32_s25 = int_to_ptr.vmem [resolvable:$true] %s31_s25 }
   0x5   :  { %p599_p1 = scmp.lt.u32.totalorder %s595_s28, %s871_s1 }
   0x7   :  { %p601_p2 = pnand %p599_p1, %p596_p0 }
   0x9   :  { %604 = shalt.err (!%p601_p2)
}
   0xa   :  { %s605_s10 = scalar_lea.vmem %s32_s25, 1024  ;;  %p610_p4 = scmp.lt.s32.totalorder %s32_s25, %s32_s25 }
   0xb   :  { %p606_p3 = scmp.ne.s32.totalorder %s32_s25, %s605_s10  ;;  %p611_p5 = scmp.lt.s32.totalorder %s605_s10, %s605_s10 }
   0xd   :  { %p612_p6 = por %p611_p5, %p610_p4 }
   0xf   :  { %p613_p7 = pnand %p612_p6, %p606_p3 }
  0x11   :  { %616 = shalt.err (!%p613_p7)
}
  0x12   :  { %s714_s11 = smov 64   ;;  %s715_s12 = smov 4  }
  0x13   :  { %37 = dma.hbm_to_vmem [thread:$0]  %s871_s1, 1024, %s32_s25, [#allocation6], %s714_s11, %s714_s11, %s715_s12  }
  0x14   :  { %s716_s15 = smov [#allocation2]   ;;  %s717_s17 = smov [#allocation7]  }
  0x15   :  { %s22_s16 = sshll.u32 %s716_s15, 4  ;;  %s45_s18 = sshll.u32 %s717_s17, 4  ;;  %s23_s16 = int_to_ptr.vmem [resolvable:$true] %s22_s16  ;;  %s46_s18 = int_to_ptr.vmem [resolvable:$true] %s45_s18 }
  0x16   :  { %s617_s21 = scalar_lea.hbm %s870_s0, 64 }
  0x17   :  { %p618_p8 = scmp.ne.s32.totalorder %s870_s0, %s617_s21  ;;  %p621_p9 = scmp.lt.u32.totalorder %s617_s21, %s870_s0 }
  0x19   :  { %p623_p10 = pnand %p621_p9, %p618_p8 }
  0x1b   :  { %626 = shalt.err (!%p623_p10)
}
  0x1c   :  { %s627_s1 = scalar_lea.vmem %s23_s16, 64  ;;  %p632_p12 = scmp.lt.s32.totalorder %s23_s16, %s23_s16 }
  0x1d   :  { %p628_p11 = scmp.ne.s32.totalorder %s23_s16, %s627_s1  ;;  %p633_p13 = scmp.lt.s32.totalorder %s627_s1, %s627_s1 }
  0x1f   :  { %p634_p0 = por %p633_p13, %p632_p12 }
  0x21   :  { %p635_p1 = pnand %p634_p0, %p628_p11 }
  0x23   :  { %638 = shalt.err (!%p635_p1)
}
  0x24   :  { %25 = dma.hbm_to_vmem [thread:$0]  %s870_s0, 64, %s23_s16, [#allocation3]  }
  0x25   :  { %s639_s30 = scalar_lea.hbm %s873_s3, 1024 }
  0x26   :  { %p640_p2 = scmp.ne.s32.totalorder %s873_s3, %s639_s30  ;;  %p643_p3 = scmp.lt.u32.totalorder %s639_s30, %s873_s3 }
  0x28   :  { %p645_p4 = pnand %p643_p3, %p640_p2 }
  0x2a   :  { %648 = shalt.err (!%p645_p4)
}
  0x2b   :  { %s649_s14 = scalar_lea.vmem %s46_s18, 1024  ;;  %p654_p6 = scmp.lt.s32.totalorder %s46_s18, %s46_s18 }
  0x2c   :  { %p650_p5 = scmp.ne.s32.totalorder %s46_s18, %s649_s14  ;;  %p655_p7 = scmp.lt.s32.totalorder %s649_s14, %s649_s14 }
  0x2e   :  { %p656_p8 = por %p655_p7, %p654_p6 }
  0x30   :  { %p657_p9 = pnand %p656_p8, %p650_p5 }
  0x32   :  { %660 = shalt.err (!%p657_p9)
}
  0x33   :  { %51 = dma.hbm_to_vmem [thread:$0]  %s873_s3, 1024, %s46_s18, [#allocation6], %s714_s11, %s714_s11, %s715_s12  }
  0x34   :  { %s718_s16 = smov [#allocation8]   ;;  %s661_s21 = scalar_lea.hbm %s875_s5, 1024 }
  0x35   :  { %s59_s17 = sshll.u32 %s718_s16, 4  ;;  %p662_p10 = scmp.ne.s32.totalorder %s875_s5, %s661_s21  ;;  %s60_s17 = int_to_ptr.vmem [resolvable:$true] %s59_s17 }
  0x36   :  { %p665_p11 = scmp.lt.u32.totalorder %s661_s21, %s875_s5 }
  0x38   :  { %p667_p12 = pnand %p665_p11, %p662_p10 }
  0x3a   :  { %670 = shalt.err (!%p667_p12)
}
  0x3b   :  { %s671_s1 = scalar_lea.vmem %s60_s17, 1024  ;;  %p676_p0 = scmp.lt.s32.totalorder %s60_s17, %s60_s17 }
  0x3c   :  { %p672_p13 = scmp.ne.s32.totalorder %s60_s17, %s671_s1  ;;  %p677_p1 = scmp.lt.s32.totalorder %s671_s1, %s671_s1 }
  0x3e   :  { %p678_p2 = por %p677_p1, %p676_p0 }
  0x40   :  { %p679_p3 = pnand %p678_p2, %p672_p13 }
  0x42   :  { %682 = shalt.err (!%p679_p3)
}
  0x43   :  { %65 = dma.hbm_to_vmem [thread:$0]  %s875_s5, 1024, %s60_s17, [#allocation9], %s714_s11, %s714_s11, %s715_s12  }
  0x44   :  { %705 = dma.done.wait [#allocation3], 64  }
  0x45   :  { %706 = vsyncadd [#allocation3], 4294967232 }
  0x46   :  { %707 = dma.done.wait [#allocation6], 2048  }
  0x47   :  { %708 = vsyncadd [#allocation6], 4294965248 }
  0x48   :  { %709 = dma.done.wait [#allocation9], 1024  }
  0x49   :  { %710 = vsyncadd [#allocation9], 4294966272  ;;  %v719_v0 = vmov 0.0   ;;  %vm720_vm0 = vmmov 0   ;;  %v567_v1 = vld [vmem:[#allocation5] sm:$0xff]   ;;  %v568_v2 = vld [vmem:[#allocation5 + $0x8] sm:$0xff]  }
  0x4a   :  { %498 = vmatprep.subr.bf16.mxu0 %v719_v0  ;;  %514 = vmatprep.mubr.msk.bf16.mxu0 %vm720_vm0, %v719_v0  ;;  %v569_v3 = vld [vmem:[#allocation5 + $0x10] sm:$0xff]   ;;  %v575_v4 = vld [vmem:[#allocation7] sm:$0xff]   ;;  %v570_v5 = vld [vmem:[#allocation5 + $0x18] sm:$0xff]  }
  0x4b   :  { %518 = vmatprep.subr.bf16.mxu1 %v719_v0  ;;  %534 = vmatprep.mubr.msk.bf16.mxu1 %vm720_vm0, %v719_v0  ;;  %v576_v6 = vld [vmem:[#allocation7 + $0x8] sm:$0xff]   ;;  %v571_v7 = vld [vmem:[#allocation5 + $0x20] sm:$0xff]   ;;  %v577_v8 = vld [vmem:[#allocation7 + $0x10] sm:$0xff]  }
  0x4c   :  { %499 = vmatpush3.bf16.msra.mxu0 %v567_v1  ;;  %519 = vmatpush3.bf16.msra.mxu1 %v575_v4  ;;  %v572_v9 = vld [vmem:[#allocation5 + $0x28] sm:$0xff]   ;;  %v578_v10 = vld [vmem:[#allocation7 + $0x18] sm:$0xff]   ;;  %v573_v11 = vld [vmem:[#allocation5 + $0x30] sm:$0xff]  }
  0x4d   :  { %500 = vmatprep.subr.bf16.mxu0 %v719_v0  ;;  %520 = vmatprep.subr.bf16.mxu1 %v719_v0  ;;  %v579_v12 = vld [vmem:[#allocation7 + $0x20] sm:$0xff]   ;;  %v574_v13 = vld [vmem:[#allocation5 + $0x38] sm:$0xff]   ;;  %v580_v14 = vld [vmem:[#allocation7 + $0x28] sm:$0xff]  }
  0x4e   :  { %v81_v15 = vld [vmem:[#allocation2] sm:$0xf]  ;;  %v581_v16 = vld [vmem:[#allocation7 + $0x30] sm:$0xff]   ;;  %v583_v18 = vld [vmem:[#allocation8] sm:$0xff]  }
  0x4f   :  { %v582_v17 = vld [vmem:[#allocation7 + $0x38] sm:$0xff]   ;;  %v584_v19 = vld [vmem:[#allocation8 + $0x8] sm:$0xff]   ;;  %v585_v20 = vld [vmem:[#allocation8 + $0x10] sm:$0xff]  }
  0x50   :  { %501 = vmatpush3.bf16.msra.mxu0 %v568_v2  ;;  %521 = vmatpush3.bf16.msra.mxu1 %v576_v6  ;;  %v586_v21 = vld [vmem:[#allocation8 + $0x18] sm:$0xff]   ;;  %v587_v22 = vld [vmem:[#allocation8 + $0x20] sm:$0xff]   ;;  %v588_v23 = vld [vmem:[#allocation8 + $0x28] sm:$0xff]  }
  0x51   :  { %502 = vmatprep.subr.bf16.mxu0 %v719_v0  ;;  %522 = vmatprep.subr.bf16.mxu1 %v719_v0  ;;  %v443_v24 = vld [vmem:[%s872_s2] ss:$0 sm:$0xff]  ;;  %v589_v32 = vld [vmem:[#allocation8 + $0x30] sm:$0xff]  }
  0x52   :  { %v590_v33 = vld [vmem:[#allocation8 + $0x38] sm:$0xff]  }
  0x53   :  { %v452_v34 = vld [vmem:[%s874_s4] ss:$0 sm:$0xff]  ;;  %s721_s4 = smov [#allocation10]  }
  0x54   :  { %503 = vmatpush3.bf16.msra.mxu0 %v569_v3  ;;  %523 = vmatpush3.bf16.msra.mxu1 %v577_v8  ;;  %v461_v42 = vld [vmem:[%s876_s6] ss:$0 sm:$0xff]  ;;  %s432_s28 = sshll.u32 %s721_s4, 4  ;;  %s433_s28 = int_to_ptr.vmem [resolvable:$true] %s432_s28 }
  0x55   :  { %504 = vmatprep.subr.bf16.mxu0 %v719_v0  ;;  %524 = vmatprep.subr.bf16.mxu1 %v719_v0  ;;  %s683_s29 = scalar_lea.vmem %s433_s28, 128  ;;  %p688_p5 = scmp.lt.s32.totalorder %s433_s28, %s433_s28 }
  0x56   :  { %p684_p4 = scmp.ne.s32.totalorder %s433_s28, %s683_s29  ;;  %p689_p6 = scmp.lt.s32.totalorder %s683_s29, %s683_s29 }
  0x58   :  { %505 = vmatpush3.bf16.msra.mxu0 %v570_v5  ;;  %525 = vmatpush3.bf16.msra.mxu1 %v578_v10  ;;  %p690_p7 = por %p689_p6, %p688_p5 }
  0x59   :  { %506 = vmatprep.subr.bf16.mxu0 %v719_v0  ;;  %526 = vmatprep.subr.bf16.mxu1 %v719_v0 }
  0x5a   :  { %p691_p8 = pnand %p690_p7, %p684_p4 }
  0x5c   :  { %507 = vmatpush3.bf16.msra.mxu0 %v571_v7  ;;  %527 = vmatpush3.bf16.msra.mxu1 %v579_v12 }
  0x5d   :  { %508 = vmatprep.subr.bf16.mxu0 %v719_v0  ;;  %528 = vmatprep.subr.bf16.mxu1 %v719_v0 }
  0x60   :  { %509 = vmatpush3.bf16.msra.mxu0 %v572_v9  ;;  %529 = vmatpush3.bf16.msra.mxu1 %v580_v14 }
  0x61   :  { %510 = vmatprep.subr.bf16.mxu0 %v719_v0  ;;  %530 = vmatprep.subr.bf16.mxu1 %v719_v0 }
  0x64   :  { %511 = vmatpush3.bf16.msra.mxu0 %v573_v11  ;;  %531 = vmatpush3.bf16.msra.mxu1 %v581_v16 }
  0x65   :  { %512 = vmatprep.subr.bf16.mxu0 %v719_v0  ;;  %532 = vmatprep.subr.bf16.mxu1 %v719_v0 }
  0x68   :  { %513 = vmatpush3.bf16.msra.mxu0 %v574_v13  ;;  %533 = vmatpush3.bf16.msra.mxu1 %v582_v17 }
  0x69   :  { %538 = vmatprep.subr.bf16.mxu0 %v719_v0 }
  0x6b   :  { %515 = vmatmul.mubr.bf16.vlgmr.msra.gmra.mrb[0].mxu0 %v81_v15 }
  0x6c   :  { %554 = vmatprep.mubr.msk.bf16.mxu0 %vm720_vm0, %v719_v0  ;;  %539 = vmatpush3.bf16.msra.mxu0 %v583_v18 }
  0x6d   :  { %540 = vmatprep.subr.bf16.mxu0 %v719_v0 }
  0x70   :  { %541 = vmatpush3.bf16.msra.mxu0 %v584_v19 }
  0x71   :  { %542 = vmatprep.subr.bf16.mxu0 %v719_v0 }
  0x74   :  { %543 = vmatpush3.bf16.msra.mxu0 %v585_v20 }
  0x75   :  { %544 = vmatprep.subr.bf16.mxu0 %v719_v0 }
  0x78   :  { %545 = vmatpush3.bf16.msra.mxu0 %v586_v21 }
  0x79   :  { %546 = vmatprep.subr.bf16.mxu0 %v719_v0 }
  0x7c   :  { %547 = vmatpush3.bf16.msra.mxu0 %v587_v22 }
  0x7d   :  { %548 = vmatprep.subr.bf16.mxu0 %v719_v0 }
  0x80   :  { %549 = vmatpush3.bf16.msra.mxu0 %v588_v23 }
  0x81   :  { %550 = vmatprep.subr.bf16.mxu0 %v719_v0 }
  0x84   :  { %551 = vmatpush3.bf16.msra.mxu0 %v589_v32 }
  0x85   :  { %552 = vmatprep.subr.bf16.mxu0 %v719_v0 }
  0x88   :  { %553 = vmatpush3.bf16.msra.mxu0 %v590_v33 }
 0x13e   :  { %v187_v25 = vpop.f32.mrb[0].mxu0 }
 0x13f   :  { %v188_v26 = vadd.f32 %v443_v24, %v187_v25  ;;  %v516_v27 = vpop.f32.mrb[1].mxu0 }
 0x140   :  { %v190_v28 = vpop.f32.mrb[2].mxu0 }
 0x141   :  { %v193_v29 = vmax.f32 %v188_v26, 0.0  ;;  %v517_v30 = vpop.f32.mrb[3].mxu0 }
 0x143   :  { %v194_v31 = vpack.c.bf16 %v193_v29, %v193_v29 }
 0x145   :  { %535 = vmatmul.mubr.bf16.vlgmr.msra.gmra.mrb[0].mxu1 %v194_v31 }
 0x218   :  { %v300_v35 = vpop.f32.mrb[0].mxu1 }
 0x219   :  { %v301_v36 = vadd.f32 %v452_v34, %v300_v35  ;;  %v536_v37 = vpop.f32.mrb[1].mxu1 }
 0x21a   :  { %v303_v38 = vpop.f32.mrb[2].mxu1 }
 0x21b   :  { %v306_v39 = vmax.f32 %v301_v36, 0.0  ;;  %v537_v40 = vpop.f32.mrb[3].mxu1 }
 0x21d   :  { %v307_v41 = vpack.c.bf16 %v306_v39, %v306_v39 }
 0x21f   :  { %555 = vmatmul.mubr.bf16.vlgmr.msra.gmra.mrb[4].mxu0 %v307_v41 }
 0x2f2   :  { %v413_v43 = vpop.f32.mrb[4].mxu0 }
 0x2f3   :  { %v414_v44 = vadd.f32 %v461_v42, %v413_v43  ;;  %v556_v45 = vpop.f32.mrb[5].mxu0 }
 0x2f4   :  { %v416_v46 = vpop.f32.mrb[6].mxu0 }
 0x2f5   :  { %v470_v47 = vmul.f32 -1.442695, %v414_v44  ;;  %v557_v48 = vpop.f32.mrb[7].mxu0 }
 0x2f7   :  { %591 = vpow2.f32 %v470_v47 }
 0x301   :  { %v592_v49 = vpop.eup %591 }
 0x302   :  { %v422_v50 = vadd.f32 1.0, %v592_v49 }
 0x304   :  { %593 = vrcp.f32 %v422_v50 }
 0x30e   :  { %v594_v51 = vpop.eup %593 }
 0x30f   :  { %425 = vst [vmem:[#allocation10] sm:$0xff] %v594_v51 }
 0x310   :  { %694 = shalt.err (!%p691_p8)
}
 0x311   :  { %s695_s8 = scalar_lea.hbm %s877_s7, 128 }
 0x312   :  { %p696_p9 = scmp.ne.s32.totalorder %s877_s7, %s695_s8  ;;  %p699_p10 = scmp.lt.u32.totalorder %s695_s8, %s877_s7 }
 0x314   :  { %p701_p11 = pnand %p699_p10, %p696_p9 }
 0x316   :  { %704 = shalt.err (!%p701_p11)
}
 0x317   :  { %435 = dma.vmem_to_hbm [thread:$0]  %s433_s28, 128, %s877_s7, [#allocation4]  }
 0x318   :  { %711 = dma.done.wait [#allocation4], 128  }
 0x319   :  { %712 = vsyncadd [#allocation4], 4294967168 }
 0x31a   :  { %439 = vsyncpa [#allocation3], 1 }
 0x31b   :  { %440 = vsyncpa [#allocation6], 1 }
 0x31c   :  { %441 = vsyncpa [#allocation9], 1 }
 0x31d   :  { %442 = vsyncpa [#allocation4], 1 }

</bundles_post_ra>
